<compile_context>
chip_gen: v7x
topology: tpu7x:2x2x1
jax: 0.10.0
libtpu: 0.0.40
codegen_flags: <defaults>
</compile_context>

<pallas_src>
import functools

import jax
import jax.numpy as jnp
from jax.experimental import pallas as pl
from jax.experimental.pallas import tpu as pltpu


def _mlp_kernel(x_ref, w1_ref, b1_ref, w2_ref, b2_ref, w3_ref, b3_ref, o_ref):
    """x_ref: (9, S, 128) f32 feature planes; o_ref: (S, 128) f32 outputs."""
    # Load each feature plane once; reused by all 5 fc1 output rows.
    xs = [x_ref[k] for k in range(9)]                       # 9 x (S, 128)

    g = [None, None]                                        # fc2 pre-activations
    for f in range(5):
        # fc1 row f: dense (S, 128) multiply-adds with SMEM scalar weights.
        acc = xs[0] * w1_ref[f, 0]
        for k in range(1, 9):
            acc = acc + xs[k] * w1_ref[f, k]
        h = jnp.maximum(acc + b1_ref[f], 0.0)               # bias + ReLU
        # Stream fc1 row f straight into the fc2 accumulators so only a
        # handful of (S, 128) temporaries are live at any time.
        for j in range(2):
            t = w2_ref[j, f] * h
            g[j] = t if g[j] is None else g[j] + t

    h2_0 = jnp.maximum(g[0] + b2_ref[0], 0.0)               # fc2 + ReLU
    h2_1 = jnp.maximum(g[1] + b2_ref[1], 0.0)

    # fc3 (no activation) -> dense, unmasked (S, 128) store.
    o_ref[...] = w3_ref[0, 0] * h2_0 + w3_ref[0, 1] * h2_1 + b3_ref[0]


def net_forward_feature_major(x_fm, params, *, batch_tile=131072):
    """x_fm: (9, B) float32 feature-major input. Returns (B, 1) float32."""
    F, B = x_fm.shape
    assert F == 9, x_fm.shape

    # Defensive reshapes so PyTorch-shaped params ((5,), (5,1), ...) all work.
    w1 = params["w1"].reshape(5, 9).astype(jnp.float32)
    b1 = params["b1"].reshape(5).astype(jnp.float32)
    w2 = params["w2"].reshape(2, 5).astype(jnp.float32)
    b2 = params["b2"].reshape(2).astype(jnp.float32)
    w3 = params["w3"].reshape(1, 2).astype(jnp.float32)
    b3 = params["b3"].reshape(1).astype(jnp.float32)

    # Pad the batch to whole 128-lane groups (<=127 columns, only when needed;
    # no full tile-width zero fill).  Under jit this fuses into the producer
    # copy (e.g. the transpose in net_forward).
    Bp = pl.cdiv(B, 128) * 128
    if Bp != B:
        x_fm = jnp.pad(x_fm, ((0, 0), (0, Bp - B)))
    Sp = Bp // 128
    x3 = x_fm.reshape(9, Sp, 128)        # free: row-major metadata reshape

    # Batch tile of batch_tile elements == s_tile sublane-rows of 128 lanes.
    s_tile = max(8, (int(batch_tile) // 1024) * 8)   # multiple of 8 sublanes
    s_tile = min(s_tile, Sp)                         # or full (tiny batches)
    n_steps = pl.cdiv(Sp, s_tile)                    # ragged tail -> clamped

    smem = pl.BlockSpec(memory_space=pltpu.MemorySpace.SMEM)
    out = pl.pallas_call(
        _mlp_kernel,
        out_shape=jax.ShapeDtypeStruct((Sp, 128), jnp.float32),
        grid=(n_steps,),
        in_specs=[
            pl.BlockSpec((9, s_tile, 128), lambda i: (0, i, 0)),  # x (pipelined)
            smem, smem, smem, smem, smem, smem,                   # weights/biases
        ],
        out_specs=pl.BlockSpec((s_tile, 128), lambda i: (i, 0)),
        compiler_params=pltpu.CompilerParams(
            dimension_semantics=("parallel",),
            vmem_limit_bytes=48 * 1024 * 1024,
        ),
        cost_estimate=pl.CostEstimate(
            flops=121 * Bp, transcendentals=0, bytes_accessed=40 * Bp),
    )(x3, w1, b1, w2, b2, w3, b3)

    out = out.reshape(Bp)
    if Bp != B:
        out = out[:B]
    return out.reshape(B, 1)


@functools.partial(jax.jit, static_argnames=("batch_tile",))
def net_forward(x, params, *, batch_tile=131072):
    """x: (B, 9) float32 (PyTorch layout) -> (B, 1) float32."""
    # Single transpose is the only layout plumbing for batch-major callers
    # (the pad-to-128 above fuses into this copy).  Feature-major producers
    # should call net_forward_feature_major directly and skip it.
    return net_forward_feature_major(jnp.transpose(x), params,
                                     batch_tile=batch_tile)


def init_params(key):
    """torch.nn.Linear default init: U(-1/sqrt(fan_in), +1/sqrt(fan_in)).
    Weights stored (out, in) exactly like PyTorch; biases 1-D."""
    dims = [(5, 9), (2, 5), (1, 2)]
    params = {}
    for i, (fan_out, fan_in) in enumerate(dims, start=1):
        key, kw, kb = jax.random.split(key, 3)
        bound = 1.0 / jnp.sqrt(float(fan_in))
        params[f"w{i}"] = jax.random.uniform(
            kw, (fan_out, fan_in), jnp.float32, minval=-bound, maxval=bound)
        params[f"b{i}"] = jax.random.uniform(
            kb, (fan_out,), jnp.float32, minval=-bound, maxval=bound)
    return params


def reference_forward(x, params):
    """Pure-JAX reference mirroring the PyTorch module (batch-major)."""
    h1 = jnp.maximum(x @ params["w1"].T + params["b1"].reshape(1, -1), 0.0)
    h2 = jnp.maximum(h1 @ params["w2"].T + params["b2"].reshape(1, -1), 0.0)
    return h2 @ params["w3"].T + params["b3"].reshape(1, -1)


if __name__ == "__main__":
    key = jax.random.PRNGKey(0)
    key, kx1, kx2 = jax.random.split(key, 3)
    params = init_params(key)

    # 1) Small ragged batch (B % 128 != 0): exercises pad-to-128 + tail slice.
    B1 = 200
    x1 = jax.random.normal(kx1, (B1, 9), dtype=jnp.float32)
    out1 = jax.block_until_ready(net_forward(x1, params))
    ref1 = reference_forward(x1, params)
    assert out1.shape == (B1, 1), out1.shape
    assert jnp.allclose(out1, ref1, atol=1e-5, rtol=1e-5)

    # 2) Multi-step grid with a ragged last tile (small batch_tile override):
    #    exercises the pipelined grid + Pallas bounds clamping.
    B2 = 1200
    x2 = jax.random.normal(kx2, (B2, 9), dtype=jnp.float32)
    out2 = jax.block_until_ready(net_forward(x2, params, batch_tile=1024))
    ref2 = reference_forward(x2, params)
    assert out2.shape == (B2, 1), out2.shape
    assert jnp.allclose(out2, ref2, atol=1e-5, rtol=1e-5)

    print("KERNEL_OK")
</pallas_src>

<mosaic_0001>
module attributes {stable_mosaic.version = 11 : i64} {
  func.func @_mlp_kernel(%arg0: i32, %arg1: memref<9x2x128xf32, #tpu.memory_space<vmem>>, %arg2: memref<5x9xf32, #tpu.memory_space<smem>>, %arg3: memref<5xf32, #tpu.memory_space<smem>>, %arg4: memref<2x5xf32, #tpu.memory_space<smem>>, %arg5: memref<2xf32, #tpu.memory_space<smem>>, %arg6: memref<1x2xf32, #tpu.memory_space<smem>>, %arg7: memref<1xf32, #tpu.memory_space<smem>>, %arg8: memref<2x128xf32, #tpu.memory_space<vmem>>) attributes {dimension_semantics = [#tpu.dimension_semantics<parallel>], iteration_bounds = array<i64: 1>, scalar_prefetch = 0 : i64, scratch_operands = 0 : i64, tpu.core_type = #tpu.core_type<tc>, window_params = [{transform_indices = @transform_0, window_bounds = array<i64: 9, 2, 128>}, {transform_indices = @transform_1, window_bounds = array<i64: 5, 9>}, {transform_indices = @transform_2, window_bounds = array<i64: 5>}, {transform_indices = @transform_3, window_bounds = array<i64: 2, 5>}, {transform_indices = @transform_4, window_bounds = array<i64: 2>}, {transform_indices = @transform_5, window_bounds = array<i64: 1, 2>}, {transform_indices = @transform_6, window_bounds = array<i64: 1>}, {transform_indices = @transform_7, window_bounds = array<i64: 2, 128>}]} {
    %c0 = arith.constant 0 : index
    %c0_0 = arith.constant 0 : index
    %c0_1 = arith.constant 0 : index
    %0 = vector.load %arg1[%c0, %c0_0, %c0_1] : memref<9x2x128xf32, #tpu.memory_space<vmem>>, vector<1x2x128xf32>
    %1 = vector.shape_cast %0 : vector<1x2x128xf32> to vector<2x128xf32>
    %c1 = arith.constant 1 : index
    %c0_2 = arith.constant 0 : index
    %c0_3 = arith.constant 0 : index
    %2 = vector.load %arg1[%c1, %c0_2, %c0_3] : memref<9x2x128xf32, #tpu.memory_space<vmem>>, vector<1x2x128xf32>
    %3 = vector.shape_cast %2 : vector<1x2x128xf32> to vector<2x128xf32>
    %c2 = arith.constant 2 : index
    %c0_4 = arith.constant 0 : index
    %c0_5 = arith.constant 0 : index
    %4 = vector.load %arg1[%c2, %c0_4, %c0_5] : memref<9x2x128xf32, #tpu.memory_space<vmem>>, vector<1x2x128xf32>
    %5 = vector.shape_cast %4 : vector<1x2x128xf32> to vector<2x128xf32>
    %c3 = arith.constant 3 : index
    %c0_6 = arith.constant 0 : index
    %c0_7 = arith.constant 0 : index
    %6 = vector.load %arg1[%c3, %c0_6, %c0_7] : memref<9x2x128xf32, #tpu.memory_space<vmem>>, vector<1x2x128xf32>
    %7 = vector.shape_cast %6 : vector<1x2x128xf32> to vector<2x128xf32>
    %c4 = arith.constant 4 : index
    %c0_8 = arith.constant 0 : index
    %c0_9 = arith.constant 0 : index
    %8 = vector.load %arg1[%c4, %c0_8, %c0_9] : memref<9x2x128xf32, #tpu.memory_space<vmem>>, vector<1x2x128xf32>
    %9 = vector.shape_cast %8 : vector<1x2x128xf32> to vector<2x128xf32>
    %c5 = arith.constant 5 : index
    %c0_10 = arith.constant 0 : index
    %c0_11 = arith.constant 0 : index
    %10 = vector.load %arg1[%c5, %c0_10, %c0_11] : memref<9x2x128xf32, #tpu.memory_space<vmem>>, vector<1x2x128xf32>
    %11 = vector.shape_cast %10 : vector<1x2x128xf32> to vector<2x128xf32>
    %c6 = arith.constant 6 : index
    %c0_12 = arith.constant 0 : index
    %c0_13 = arith.constant 0 : index
    %12 = vector.load %arg1[%c6, %c0_12, %c0_13] : memref<9x2x128xf32, #tpu.memory_space<vmem>>, vector<1x2x128xf32>
    %13 = vector.shape_cast %12 : vector<1x2x128xf32> to vector<2x128xf32>
    %c7 = arith.constant 7 : index
    %c0_14 = arith.constant 0 : index
    %c0_15 = arith.constant 0 : index
    %14 = vector.load %arg1[%c7, %c0_14, %c0_15] : memref<9x2x128xf32, #tpu.memory_space<vmem>>, vector<1x2x128xf32>
    %15 = vector.shape_cast %14 : vector<1x2x128xf32> to vector<2x128xf32>
    %c8 = arith.constant 8 : index
    %c0_16 = arith.constant 0 : index
    %c0_17 = arith.constant 0 : index
    %16 = vector.load %arg1[%c8, %c0_16, %c0_17] : memref<9x2x128xf32, #tpu.memory_space<vmem>>, vector<1x2x128xf32>
    %17 = vector.shape_cast %16 : vector<1x2x128xf32> to vector<2x128xf32>
    %c0_18 = arith.constant 0 : index
    %c0_19 = arith.constant 0 : index
    %18 = memref.load %arg2[%c0_18, %c0_19] : memref<5x9xf32, #tpu.memory_space<smem>>
    %19 = vector.broadcast %18 : f32 to vector<2x128xf32>
    %20 = arith.mulf %1, %19 : vector<2x128xf32>
    %c0_20 = arith.constant 0 : index
    %c1_21 = arith.constant 1 : index
    %21 = memref.load %arg2[%c0_20, %c1_21] : memref<5x9xf32, #tpu.memory_space<smem>>
    %22 = vector.broadcast %21 : f32 to vector<2x128xf32>
    %23 = arith.mulf %3, %22 : vector<2x128xf32>
    %24 = arith.addf %20, %23 : vector<2x128xf32>
    %c0_22 = arith.constant 0 : index
    %c2_23 = arith.constant 2 : index
    %25 = memref.load %arg2[%c0_22, %c2_23] : memref<5x9xf32, #tpu.memory_space<smem>>
    %26 = vector.broadcast %25 : f32 to vector<2x128xf32>
    %27 = arith.mulf %5, %26 : vector<2x128xf32>
    %28 = arith.addf %24, %27 : vector<2x128xf32>
    %c0_24 = arith.constant 0 : index
    %c3_25 = arith.constant 3 : index
    %29 = memref.load %arg2[%c0_24, %c3_25] : memref<5x9xf32, #tpu.memory_space<smem>>
    %30 = vector.broadcast %29 : f32 to vector<2x128xf32>
    %31 = arith.mulf %7, %30 : vector<2x128xf32>
    %32 = arith.addf %28, %31 : vector<2x128xf32>
    %c0_26 = arith.constant 0 : index
    %c4_27 = arith.constant 4 : index
    %33 = memref.load %arg2[%c0_26, %c4_27] : memref<5x9xf32, #tpu.memory_space<smem>>
    %34 = vector.broadcast %33 : f32 to vector<2x128xf32>
    %35 = arith.mulf %9, %34 : vector<2x128xf32>
    %36 = arith.addf %32, %35 : vector<2x128xf32>
    %c0_28 = arith.constant 0 : index
    %c5_29 = arith.constant 5 : index
    %37 = memref.load %arg2[%c0_28, %c5_29] : memref<5x9xf32, #tpu.memory_space<smem>>
    %38 = vector.broadcast %37 : f32 to vector<2x128xf32>
    %39 = arith.mulf %11, %38 : vector<2x128xf32>
    %40 = arith.addf %36, %39 : vector<2x128xf32>
    %c0_30 = arith.constant 0 : index
    %c6_31 = arith.constant 6 : index
    %41 = memref.load %arg2[%c0_30, %c6_31] : memref<5x9xf32, #tpu.memory_space<smem>>
    %42 = vector.broadcast %41 : f32 to vector<2x128xf32>
    %43 = arith.mulf %13, %42 : vector<2x128xf32>
    %44 = arith.addf %40, %43 : vector<2x128xf32>
    %c0_32 = arith.constant 0 : index
    %c7_33 = arith.constant 7 : index
    %45 = memref.load %arg2[%c0_32, %c7_33] : memref<5x9xf32, #tpu.memory_space<smem>>
    %46 = vector.broadcast %45 : f32 to vector<2x128xf32>
    %47 = arith.mulf %15, %46 : vector<2x128xf32>
    %48 = arith.addf %44, %47 : vector<2x128xf32>
    %c0_34 = arith.constant 0 : index
    %c8_35 = arith.constant 8 : index
    %49 = memref.load %arg2[%c0_34, %c8_35] : memref<5x9xf32, #tpu.memory_space<smem>>
    %50 = vector.broadcast %49 : f32 to vector<2x128xf32>
    %51 = arith.mulf %17, %50 : vector<2x128xf32>
    %52 = arith.addf %48, %51 : vector<2x128xf32>
    %c0_36 = arith.constant 0 : index
    %53 = memref.load %arg3[%c0_36] : memref<5xf32, #tpu.memory_space<smem>>
    %54 = vector.broadcast %53 : f32 to vector<2x128xf32>
    %55 = arith.addf %52, %54 : vector<2x128xf32>
    %cst = arith.constant 0.000000e+00 : f32
    %56 = vector.broadcast %cst : f32 to vector<2x128xf32>
    %57 = arith.maximumf %55, %56 : vector<2x128xf32>
    %c0_37 = arith.constant 0 : index
    %c0_38 = arith.constant 0 : index
    %58 = memref.load %arg4[%c0_37, %c0_38] : memref<2x5xf32, #tpu.memory_space<smem>>
    %59 = vector.broadcast %58 : f32 to vector<2x128xf32>
    %60 = arith.mulf %59, %57 : vector<2x128xf32>
    %c1_39 = arith.constant 1 : index
    %c0_40 = arith.constant 0 : index
    %61 = memref.load %arg4[%c1_39, %c0_40] : memref<2x5xf32, #tpu.memory_space<smem>>
    %62 = vector.broadcast %61 : f32 to vector<2x128xf32>
    %63 = arith.mulf %62, %57 : vector<2x128xf32>
    %c1_41 = arith.constant 1 : index
    %c0_42 = arith.constant 0 : index
    %64 = memref.load %arg2[%c1_41, %c0_42] : memref<5x9xf32, #tpu.memory_space<smem>>
    %65 = vector.broadcast %64 : f32 to vector<2x128xf32>
    %66 = arith.mulf %1, %65 : vector<2x128xf32>
    %c1_43 = arith.constant 1 : index
    %c1_44 = arith.constant 1 : index
    %67 = memref.load %arg2[%c1_43, %c1_44] : memref<5x9xf32, #tpu.memory_space<smem>>
    %68 = vector.broadcast %67 : f32 to vector<2x128xf32>
    %69 = arith.mulf %3, %68 : vector<2x128xf32>
    %70 = arith.addf %66, %69 : vector<2x128xf32>
    %c1_45 = arith.constant 1 : index
    %c2_46 = arith.constant 2 : index
    %71 = memref.load %arg2[%c1_45, %c2_46] : memref<5x9xf32, #tpu.memory_space<smem>>
    %72 = vector.broadcast %71 : f32 to vector<2x128xf32>
    %73 = arith.mulf %5, %72 : vector<2x128xf32>
    %74 = arith.addf %70, %73 : vector<2x128xf32>
    %c1_47 = arith.constant 1 : index
    %c3_48 = arith.constant 3 : index
    %75 = memref.load %arg2[%c1_47, %c3_48] : memref<5x9xf32, #tpu.memory_space<smem>>
    %76 = vector.broadcast %75 : f32 to vector<2x128xf32>
    %77 = arith.mulf %7, %76 : vector<2x128xf32>
    %78 = arith.addf %74, %77 : vector<2x128xf32>
    %c1_49 = arith.constant 1 : index
    %c4_50 = arith.constant 4 : index
    %79 = memref.load %arg2[%c1_49, %c4_50] : memref<5x9xf32, #tpu.memory_space<smem>>
    %80 = vector.broadcast %79 : f32 to vector<2x128xf32>
    %81 = arith.mulf %9, %80 : vector<2x128xf32>
    %82 = arith.addf %78, %81 : vector<2x128xf32>
    %c1_51 = arith.constant 1 : index
    %c5_52 = arith.constant 5 : index
    %83 = memref.load %arg2[%c1_51, %c5_52] : memref<5x9xf32, #tpu.memory_space<smem>>
    %84 = vector.broadcast %83 : f32 to vector<2x128xf32>
    %85 = arith.mulf %11, %84 : vector<2x128xf32>
    %86 = arith.addf %82, %85 : vector<2x128xf32>
    %c1_53 = arith.constant 1 : index
    %c6_54 = arith.constant 6 : index
    %87 = memref.load %arg2[%c1_53, %c6_54] : memref<5x9xf32, #tpu.memory_space<smem>>
    %88 = vector.broadcast %87 : f32 to vector<2x128xf32>
    %89 = arith.mulf %13, %88 : vector<2x128xf32>
    %90 = arith.addf %86, %89 : vector<2x128xf32>
    %c1_55 = arith.constant 1 : index
    %c7_56 = arith.constant 7 : index
    %91 = memref.load %arg2[%c1_55, %c7_56] : memref<5x9xf32, #tpu.memory_space<smem>>
    %92 = vector.broadcast %91 : f32 to vector<2x128xf32>
    %93 = arith.mulf %15, %92 : vector<2x128xf32>
    %94 = arith.addf %90, %93 : vector<2x128xf32>
    %c1_57 = arith.constant 1 : index
    %c8_58 = arith.constant 8 : index
    %95 = memref.load %arg2[%c1_57, %c8_58] : memref<5x9xf32, #tpu.memory_space<smem>>
    %96 = vector.broadcast %95 : f32 to vector<2x128xf32>
    %97 = arith.mulf %17, %96 : vector<2x128xf32>
    %98 = arith.addf %94, %97 : vector<2x128xf32>
    %c1_59 = arith.constant 1 : index
    %99 = memref.load %arg3[%c1_59] : memref<5xf32, #tpu.memory_space<smem>>
    %100 = vector.broadcast %99 : f32 to vector<2x128xf32>
    %101 = arith.addf %98, %100 : vector<2x128xf32>
    %cst_60 = arith.constant 0.000000e+00 : f32
    %102 = vector.broadcast %cst_60 : f32 to vector<2x128xf32>
    %103 = arith.maximumf %101, %102 : vector<2x128xf32>
    %c0_61 = arith.constant 0 : index
    %c1_62 = arith.constant 1 : index
    %104 = memref.load %arg4[%c0_61, %c1_62] : memref<2x5xf32, #tpu.memory_space<smem>>
    %105 = vector.broadcast %104 : f32 to vector<2x128xf32>
    %106 = arith.mulf %105, %103 : vector<2x128xf32>
    %107 = arith.addf %60, %106 : vector<2x128xf32>
    %c1_63 = arith.constant 1 : index
    %c1_64 = arith.constant 1 : index
    %108 = memref.load %arg4[%c1_63, %c1_64] : memref<2x5xf32, #tpu.memory_space<smem>>
    %109 = vector.broadcast %108 : f32 to vector<2x128xf32>
    %110 = arith.mulf %109, %103 : vector<2x128xf32>
    %111 = arith.addf %63, %110 : vector<2x128xf32>
    %c2_65 = arith.constant 2 : index
    %c0_66 = arith.constant 0 : index
    %112 = memref.load %arg2[%c2_65, %c0_66] : memref<5x9xf32, #tpu.memory_space<smem>>
    %113 = vector.broadcast %112 : f32 to vector<2x128xf32>
    %114 = arith.mulf %1, %113 : vector<2x128xf32>
    %c2_67 = arith.constant 2 : index
    %c1_68 = arith.constant 1 : index
    %115 = memref.load %arg2[%c2_67, %c1_68] : memref<5x9xf32, #tpu.memory_space<smem>>
    %116 = vector.broadcast %115 : f32 to vector<2x128xf32>
    %117 = arith.mulf %3, %116 : vector<2x128xf32>
    %118 = arith.addf %114, %117 : vector<2x128xf32>
    %c2_69 = arith.constant 2 : index
    %c2_70 = arith.constant 2 : index
    %119 = memref.load %arg2[%c2_69, %c2_70] : memref<5x9xf32, #tpu.memory_space<smem>>
    %120 = vector.broadcast %119 : f32 to vector<2x128xf32>
    %121 = arith.mulf %5, %120 : vector<2x128xf32>
    %122 = arith.addf %118, %121 : vector<2x128xf32>
    %c2_71 = arith.constant 2 : index
    %c3_72 = arith.constant 3 : index
    %123 = memref.load %arg2[%c2_71, %c3_72] : memref<5x9xf32, #tpu.memory_space<smem>>
    %124 = vector.broadcast %123 : f32 to vector<2x128xf32>
    %125 = arith.mulf %7, %124 : vector<2x128xf32>
    %126 = arith.addf %122, %125 : vector<2x128xf32>
    %c2_73 = arith.constant 2 : index
    %c4_74 = arith.constant 4 : index
    %127 = memref.load %arg2[%c2_73, %c4_74] : memref<5x9xf32, #tpu.memory_space<smem>>
    %128 = vector.broadcast %127 : f32 to vector<2x128xf32>
    %129 = arith.mulf %9, %128 : vector<2x128xf32>
    %130 = arith.addf %126, %129 : vector<2x128xf32>
    %c2_75 = arith.constant 2 : index
    %c5_76 = arith.constant 5 : index
    %131 = memref.load %arg2[%c2_75, %c5_76] : memref<5x9xf32, #tpu.memory_space<smem>>
    %132 = vector.broadcast %131 : f32 to vector<2x128xf32>
    %133 = arith.mulf %11, %132 : vector<2x128xf32>
    %134 = arith.addf %130, %133 : vector<2x128xf32>
    %c2_77 = arith.constant 2 : index
    %c6_78 = arith.constant 6 : index
    %135 = memref.load %arg2[%c2_77, %c6_78] : memref<5x9xf32, #tpu.memory_space<smem>>
    %136 = vector.broadcast %135 : f32 to vector<2x128xf32>
    %137 = arith.mulf %13, %136 : vector<2x128xf32>
    %138 = arith.addf %134, %137 : vector<2x128xf32>
    %c2_79 = arith.constant 2 : index
    %c7_80 = arith.constant 7 : index
    %139 = memref.load %arg2[%c2_79, %c7_80] : memref<5x9xf32, #tpu.memory_space<smem>>
    %140 = vector.broadcast %139 : f32 to vector<2x128xf32>
    %141 = arith.mulf %15, %140 : vector<2x128xf32>
    %142 = arith.addf %138, %141 : vector<2x128xf32>
    %c2_81 = arith.constant 2 : index
    %c8_82 = arith.constant 8 : index
    %143 = memref.load %arg2[%c2_81, %c8_82] : memref<5x9xf32, #tpu.memory_space<smem>>
    %144 = vector.broadcast %143 : f32 to vector<2x128xf32>
    %145 = arith.mulf %17, %144 : vector<2x128xf32>
    %146 = arith.addf %142, %145 : vector<2x128xf32>
    %c2_83 = arith.constant 2 : index
    %147 = memref.load %arg3[%c2_83] : memref<5xf32, #tpu.memory_space<smem>>
    %148 = vector.broadcast %147 : f32 to vector<2x128xf32>
    %149 = arith.addf %146, %148 : vector<2x128xf32>
    %cst_84 = arith.constant 0.000000e+00 : f32
    %150 = vector.broadcast %cst_84 : f32 to vector<2x128xf32>
    %151 = arith.maximumf %149, %150 : vector<2x128xf32>
    %c0_85 = arith.constant 0 : index
    %c2_86 = arith.constant 2 : index
    %152 = memref.load %arg4[%c0_85, %c2_86] : memref<2x5xf32, #tpu.memory_space<smem>>
    %153 = vector.broadcast %152 : f32 to vector<2x128xf32>
    %154 = arith.mulf %153, %151 : vector<2x128xf32>
    %155 = arith.addf %107, %154 : vector<2x128xf32>
    %c1_87 = arith.constant 1 : index
    %c2_88 = arith.constant 2 : index
    %156 = memref.load %arg4[%c1_87, %c2_88] : memref<2x5xf32, #tpu.memory_space<smem>>
    %157 = vector.broadcast %156 : f32 to vector<2x128xf32>
    %158 = arith.mulf %157, %151 : vector<2x128xf32>
    %159 = arith.addf %111, %158 : vector<2x128xf32>
    %c3_89 = arith.constant 3 : index
    %c0_90 = arith.constant 0 : index
    %160 = memref.load %arg2[%c3_89, %c0_90] : memref<5x9xf32, #tpu.memory_space<smem>>
    %161 = vector.broadcast %160 : f32 to vector<2x128xf32>
    %162 = arith.mulf %1, %161 : vector<2x128xf32>
    %c3_91 = arith.constant 3 : index
    %c1_92 = arith.constant 1 : index
    %163 = memref.load %arg2[%c3_91, %c1_92] : memref<5x9xf32, #tpu.memory_space<smem>>
    %164 = vector.broadcast %163 : f32 to vector<2x128xf32>
    %165 = arith.mulf %3, %164 : vector<2x128xf32>
    %166 = arith.addf %162, %165 : vector<2x128xf32>
    %c3_93 = arith.constant 3 : index
    %c2_94 = arith.constant 2 : index
    %167 = memref.load %arg2[%c3_93, %c2_94] : memref<5x9xf32, #tpu.memory_space<smem>>
    %168 = vector.broadcast %167 : f32 to vector<2x128xf32>
    %169 = arith.mulf %5, %168 : vector<2x128xf32>
    %170 = arith.addf %166, %169 : vector<2x128xf32>
    %c3_95 = arith.constant 3 : index
    %c3_96 = arith.constant 3 : index
    %171 = memref.load %arg2[%c3_95, %c3_96] : memref<5x9xf32, #tpu.memory_space<smem>>
    %172 = vector.broadcast %171 : f32 to vector<2x128xf32>
    %173 = arith.mulf %7, %172 : vector<2x128xf32>
    %174 = arith.addf %170, %173 : vector<2x128xf32>
    %c3_97 = arith.constant 3 : index
    %c4_98 = arith.constant 4 : index
    %175 = memref.load %arg2[%c3_97, %c4_98] : memref<5x9xf32, #tpu.memory_space<smem>>
    %176 = vector.broadcast %175 : f32 to vector<2x128xf32>
    %177 = arith.mulf %9, %176 : vector<2x128xf32>
    %178 = arith.addf %174, %177 : vector<2x128xf32>
    %c3_99 = arith.constant 3 : index
    %c5_100 = arith.constant 5 : index
    %179 = memref.load %arg2[%c3_99, %c5_100] : memref<5x9xf32, #tpu.memory_space<smem>>
    %180 = vector.broadcast %179 : f32 to vector<2x128xf32>
    %181 = arith.mulf %11, %180 : vector<2x128xf32>
    %182 = arith.addf %178, %181 : vector<2x128xf32>
    %c3_101 = arith.constant 3 : index
    %c6_102 = arith.constant 6 : index
    %183 = memref.load %arg2[%c3_101, %c6_102] : memref<5x9xf32, #tpu.memory_space<smem>>
    %184 = vector.broadcast %183 : f32 to vector<2x128xf32>
    %185 = arith.mulf %13, %184 : vector<2x128xf32>
    %186 = arith.addf %182, %185 : vector<2x128xf32>
    %c3_103 = arith.constant 3 : index
    %c7_104 = arith.constant 7 : index
    %187 = memref.load %arg2[%c3_103, %c7_104] : memref<5x9xf32, #tpu.memory_space<smem>>
    %188 = vector.broadcast %187 : f32 to vector<2x128xf32>
    %189 = arith.mulf %15, %188 : vector<2x128xf32>
    %190 = arith.addf %186, %189 : vector<2x128xf32>
    %c3_105 = arith.constant 3 : index
    %c8_106 = arith.constant 8 : index
    %191 = memref.load %arg2[%c3_105, %c8_106] : memref<5x9xf32, #tpu.memory_space<smem>>
    %192 = vector.broadcast %191 : f32 to vector<2x128xf32>
    %193 = arith.mulf %17, %192 : vector<2x128xf32>
    %194 = arith.addf %190, %193 : vector<2x128xf32>
    %c3_107 = arith.constant 3 : index
    %195 = memref.load %arg3[%c3_107] : memref<5xf32, #tpu.memory_space<smem>>
    %196 = vector.broadcast %195 : f32 to vector<2x128xf32>
    %197 = arith.addf %194, %196 : vector<2x128xf32>
    %cst_108 = arith.constant 0.000000e+00 : f32
    %198 = vector.broadcast %cst_108 : f32 to vector<2x128xf32>
    %199 = arith.maximumf %197, %198 : vector<2x128xf32>
    %c0_109 = arith.constant 0 : index
    %c3_110 = arith.constant 3 : index
    %200 = memref.load %arg4[%c0_109, %c3_110] : memref<2x5xf32, #tpu.memory_space<smem>>
    %201 = vector.broadcast %200 : f32 to vector<2x128xf32>
    %202 = arith.mulf %201, %199 : vector<2x128xf32>
    %203 = arith.addf %155, %202 : vector<2x128xf32>
    %c1_111 = arith.constant 1 : index
    %c3_112 = arith.constant 3 : index
    %204 = memref.load %arg4[%c1_111, %c3_112] : memref<2x5xf32, #tpu.memory_space<smem>>
    %205 = vector.broadcast %204 : f32 to vector<2x128xf32>
    %206 = arith.mulf %205, %199 : vector<2x128xf32>
    %207 = arith.addf %159, %206 : vector<2x128xf32>
    %c4_113 = arith.constant 4 : index
    %c0_114 = arith.constant 0 : index
    %208 = memref.load %arg2[%c4_113, %c0_114] : memref<5x9xf32, #tpu.memory_space<smem>>
    %209 = vector.broadcast %208 : f32 to vector<2x128xf32>
    %210 = arith.mulf %1, %209 : vector<2x128xf32>
    %c4_115 = arith.constant 4 : index
    %c1_116 = arith.constant 1 : index
    %211 = memref.load %arg2[%c4_115, %c1_116] : memref<5x9xf32, #tpu.memory_space<smem>>
    %212 = vector.broadcast %211 : f32 to vector<2x128xf32>
    %213 = arith.mulf %3, %212 : vector<2x128xf32>
    %214 = arith.addf %210, %213 : vector<2x128xf32>
    %c4_117 = arith.constant 4 : index
    %c2_118 = arith.constant 2 : index
    %215 = memref.load %arg2[%c4_117, %c2_118] : memref<5x9xf32, #tpu.memory_space<smem>>
    %216 = vector.broadcast %215 : f32 to vector<2x128xf32>
    %217 = arith.mulf %5, %216 : vector<2x128xf32>
    %218 = arith.addf %214, %217 : vector<2x128xf32>
    %c4_119 = arith.constant 4 : index
    %c3_120 = arith.constant 3 : index
    %219 = memref.load %arg2[%c4_119, %c3_120] : memref<5x9xf32, #tpu.memory_space<smem>>
    %220 = vector.broadcast %219 : f32 to vector<2x128xf32>
    %221 = arith.mulf %7, %220 : vector<2x128xf32>
    %222 = arith.addf %218, %221 : vector<2x128xf32>
    %c4_121 = arith.constant 4 : index
    %c4_122 = arith.constant 4 : index
    %223 = memref.load %arg2[%c4_121, %c4_122] : memref<5x9xf32, #tpu.memory_space<smem>>
    %224 = vector.broadcast %223 : f32 to vector<2x128xf32>
    %225 = arith.mulf %9, %224 : vector<2x128xf32>
    %226 = arith.addf %222, %225 : vector<2x128xf32>
    %c4_123 = arith.constant 4 : index
    %c5_124 = arith.constant 5 : index
    %227 = memref.load %arg2[%c4_123, %c5_124] : memref<5x9xf32, #tpu.memory_space<smem>>
    %228 = vector.broadcast %227 : f32 to vector<2x128xf32>
    %229 = arith.mulf %11, %228 : vector<2x128xf32>
    %230 = arith.addf %226, %229 : vector<2x128xf32>
    %c4_125 = arith.constant 4 : index
    %c6_126 = arith.constant 6 : index
    %231 = memref.load %arg2[%c4_125, %c6_126] : memref<5x9xf32, #tpu.memory_space<smem>>
    %232 = vector.broadcast %231 : f32 to vector<2x128xf32>
    %233 = arith.mulf %13, %232 : vector<2x128xf32>
    %234 = arith.addf %230, %233 : vector<2x128xf32>
    %c4_127 = arith.constant 4 : index
    %c7_128 = arith.constant 7 : index
    %235 = memref.load %arg2[%c4_127, %c7_128] : memref<5x9xf32, #tpu.memory_space<smem>>
    %236 = vector.broadcast %235 : f32 to vector<2x128xf32>
    %237 = arith.mulf %15, %236 : vector<2x128xf32>
    %238 = arith.addf %234, %237 : vector<2x128xf32>
    %c4_129 = arith.constant 4 : index
    %c8_130 = arith.constant 8 : index
    %239 = memref.load %arg2[%c4_129, %c8_130] : memref<5x9xf32, #tpu.memory_space<smem>>
    %240 = vector.broadcast %239 : f32 to vector<2x128xf32>
    %241 = arith.mulf %17, %240 : vector<2x128xf32>
    %242 = arith.addf %238, %241 : vector<2x128xf32>
    %c4_131 = arith.constant 4 : index
    %243 = memref.load %arg3[%c4_131] : memref<5xf32, #tpu.memory_space<smem>>
    %244 = vector.broadcast %243 : f32 to vector<2x128xf32>
    %245 = arith.addf %242, %244 : vector<2x128xf32>
    %cst_132 = arith.constant 0.000000e+00 : f32
    %246 = vector.broadcast %cst_132 : f32 to vector<2x128xf32>
    %247 = arith.maximumf %245, %246 : vector<2x128xf32>
    %c0_133 = arith.constant 0 : index
    %c4_134 = arith.constant 4 : index
    %248 = memref.load %arg4[%c0_133, %c4_134] : memref<2x5xf32, #tpu.memory_space<smem>>
    %249 = vector.broadcast %248 : f32 to vector<2x128xf32>
    %250 = arith.mulf %249, %247 : vector<2x128xf32>
    %251 = arith.addf %203, %250 : vector<2x128xf32>
    %c1_135 = arith.constant 1 : index
    %c4_136 = arith.constant 4 : index
    %252 = memref.load %arg4[%c1_135, %c4_136] : memref<2x5xf32, #tpu.memory_space<smem>>
    %253 = vector.broadcast %252 : f32 to vector<2x128xf32>
    %254 = arith.mulf %253, %247 : vector<2x128xf32>
    %255 = arith.addf %207, %254 : vector<2x128xf32>
    %c0_137 = arith.constant 0 : index
    %256 = memref.load %arg5[%c0_137] : memref<2xf32, #tpu.memory_space<smem>>
    %257 = vector.broadcast %256 : f32 to vector<2x128xf32>
    %258 = arith.addf %251, %257 : vector<2x128xf32>
    %cst_138 = arith.constant 0.000000e+00 : f32
    %259 = vector.broadcast %cst_138 : f32 to vector<2x128xf32>
    %260 = arith.maximumf %258, %259 : vector<2x128xf32>
    %c1_139 = arith.constant 1 : index
    %261 = memref.load %arg5[%c1_139] : memref<2xf32, #tpu.memory_space<smem>>
    %262 = vector.broadcast %261 : f32 to vector<2x128xf32>
    %263 = arith.addf %255, %262 : vector<2x128xf32>
    %cst_140 = arith.constant 0.000000e+00 : f32
    %264 = vector.broadcast %cst_140 : f32 to vector<2x128xf32>
    %265 = arith.maximumf %263, %264 : vector<2x128xf32>
    %c0_141 = arith.constant 0 : index
    %c0_142 = arith.constant 0 : index
    %266 = memref.load %arg6[%c0_141, %c0_142] : memref<1x2xf32, #tpu.memory_space<smem>>
    %267 = vector.broadcast %266 : f32 to vector<2x128xf32>
    %268 = arith.mulf %267, %260 : vector<2x128xf32>
    %c0_143 = arith.constant 0 : index
    %c1_144 = arith.constant 1 : index
    %269 = memref.load %arg6[%c0_143, %c1_144] : memref<1x2xf32, #tpu.memory_space<smem>>
    %270 = vector.broadcast %269 : f32 to vector<2x128xf32>
    %271 = arith.mulf %270, %265 : vector<2x128xf32>
    %272 = arith.addf %268, %271 : vector<2x128xf32>
    %c0_145 = arith.constant 0 : index
    %273 = memref.load %arg7[%c0_145] : memref<1xf32, #tpu.memory_space<smem>>
    %274 = vector.broadcast %273 : f32 to vector<2x128xf32>
    %275 = arith.addf %272, %274 : vector<2x128xf32>
    %c0_146 = arith.constant 0 : index
    %c0_147 = arith.constant 0 : index
    %276 = vector.load %arg8[%c0_146, %c0_147] : memref<2x128xf32, #tpu.memory_space<vmem>>, vector<2x128xf32>
    tpu.vector_store %arg8[%c0_146, %c0_147], %275 {strides = array<i32>} : memref<2x128xf32, #tpu.memory_space<vmem>>, vector<2x128xf32>,
    return
  }
  func.func @transform_0(%arg0: i32) -> (i32, i32, i32) {
    %c0_i32 = arith.constant 0 : i32
    %c0_i32_0 = arith.constant 0 : i32
    %c0_i32_1 = arith.constant 0 : i32
    return %c0_i32, %arg0, %c0_i32_0 : i32, i32, i32
  }
  func.func @transform_1(%arg0: i32) -> (i32, i32) {
    %c0_i32 = arith.constant 0 : i32
    %c0_i32_0 = arith.constant 0 : i32
    %c0_i32_1 = arith.constant 0 : i32
    return %c0_i32, %c0_i32_0 : i32, i32
  }
  func.func @transform_2(%arg0: i32) -> i32 {
    %c0_i32 = arith.constant 0 : i32
    %c0_i32_0 = arith.constant 0 : i32
    return %c0_i32 : i32
  }
  func.func @transform_3(%arg0: i32) -> (i32, i32) {
    %c0_i32 = arith.constant 0 : i32
    %c0_i32_0 = arith.constant 0 : i32
    %c0_i32_1 = arith.constant 0 : i32
    return %c0_i32, %c0_i32_0 : i32, i32
  }
  func.func @transform_4(%arg0: i32) -> i32 {
    %c0_i32 = arith.constant 0 : i32
    %c0_i32_0 = arith.constant 0 : i32
    return %c0_i32 : i32
  }
  func.func @transform_5(%arg0: i32) -> (i32, i32) {
    %c0_i32 = arith.constant 0 : i32
    %c0_i32_0 = arith.constant 0 : i32
    %c0_i32_1 = arith.constant 0 : i32
    return %c0_i32, %c0_i32_0 : i32, i32
  }
  func.func @transform_6(%arg0: i32) -> i32 {
    %c0_i32 = arith.constant 0 : i32
    %c0_i32_0 = arith.constant 0 : i32
    return %c0_i32 : i32
  }
  func.func @transform_7(%arg0: i32) -> (i32, i32) {
    %c0_i32 = arith.constant 0 : i32
    %c0_i32_0 = arith.constant 0 : i32
    return %arg0, %c0_i32 : i32, i32
  }
}

</mosaic_0001>

<bundles_post_ra>
// kernel: net_forward.1
= control target key start
LH: loop header
LB: loop body
LE: loop exit
PB: predicated region body
PF: predicated region fallthrough
CT: control target
= control target key end

     0   :  { %13 = vsyncpa [#allocation5], 0  ;;  %s852_s0 = inlined_call_operand.vmem [shape: f32[9,2,128], index: 0, kind: input, shape index: {}]   ;;  %s853_s1 = inlined_call_operand.vmem [shape: f32[5,9], index: 1, kind: input, shape index: {}]   ;;  %s854_s2 = inlined_call_operand.vmem [shape: f32[5], index: 2, kind: input, shape index: {}]   ;;  %s855_s3 = inlined_call_operand.vmem [shape: f32[2,5], index: 3, kind: input, shape index: {}]   ;;  %s856_s4 = inlined_call_operand.vmem [shape: f32[2], index: 4, kind: input, shape index: {}]   ;;  %s857_s5 = inlined_call_operand.vmem [shape: f32[1,2], index: 5, kind: input, shape index: {}]   ;;  %s858_s6 = inlined_call_operand.<no memory space> [shape: f32[1], index: 6, kind: input, shape index: {}]   ;;  %s859_s7 = inlined_call_operand.hbm [shape: f32[2,128], index: 7, kind: output, shape index: {}]  }
   0x1   :  { %14 = vsyncpa [#allocation7], 0 }
   0x2   :  { %15 = vsyncpa [#allocation10], 0  ;;  %s35_s26 = sshll.u32 %s854_s2, 4  ;;  %s36_s26 = int_to_ptr.vmem [resolvable:$true] %s35_s26 }
   0x3   :  { %16 = vsyncpa [#allocation4], 0  ;;  %s55_s29 = sshll.u32 %s856_s4, 4  ;;  %s446_s30 = scalar_lea.vmem %s36_s26, 16  ;;  %s56_s29 = int_to_ptr.vmem [resolvable:$true] %s55_s29 }
   0x4   :  { %p447_p0 = scmp.ne.s32.totalorder %s36_s26, %s446_s30  ;;  %p451_p1 = scmp.lt.s32.totalorder %s36_s26, %s36_s26 }
   0x5   :  { %p452_p2 = scmp.lt.s32.totalorder %s446_s30, %s446_s30 }
   0x7   :  { %p453_p3 = por %p452_p2, %p451_p1 }
   0x9   :  { %p454_p4 = pnand %p453_p3, %p447_p0 }
   0xb   :  { %457 = shalt.err (!%p454_p4)
}
   0xc   :  { %s536_s8 = smov [#allocation6]   ;;  %s458_s9 = scalar_lea.vmem %s56_s29, 16 }
   0xd   :  { %38 = dma.vmem_to_smem %s36_s26, 16, %s536_s8, [#allocation7]  }
   0xe   :  { %p459_p5 = scmp.ne.s32.totalorder %s56_s29, %s458_s9  ;;  %p463_p6 = scmp.lt.s32.totalorder %s56_s29, %s56_s29 }
   0xf   :  { %p464_p7 = scmp.lt.s32.totalorder %s458_s9, %s458_s9 }
  0x11   :  { %p465_p8 = por %p464_p7, %p463_p6 }
  0x13   :  { %p466_p9 = pnand %p465_p8, %p459_p5 }
  0x15   :  { %469 = shalt.err (!%p466_p9)
}
  0x16   :  { %s537_s2 = smov [#allocation9]   ;;  %s25_s11 = sshll.u32 %s853_s1, 4  ;;  %s26_s11 = int_to_ptr.vmem [resolvable:$true] %s25_s11 }
  0x17   :  { %58 = dma.vmem_to_smem %s56_s29, 16, %s537_s2, [#allocation10]  }
  0x18   :  { %s45_s14 = sshll.u32 %s855_s3, 4  ;;  %s470_s15 = scalar_lea.vmem %s26_s11, 128  ;;  %s46_s14 = int_to_ptr.vmem [resolvable:$true] %s45_s14 }
  0x19   :  { %p471_p10 = scmp.ne.s32.totalorder %s26_s11, %s470_s15  ;;  %p475_p11 = scmp.lt.s32.totalorder %s26_s11, %s26_s11 }
  0x1a   :  { %p476_p12 = scmp.lt.s32.totalorder %s470_s15, %s470_s15 }
  0x1c   :  { %p477_p13 = por %p476_p12, %p475_p11 }
  0x1e   :  { %p478_p0 = pnand %p477_p13, %p471_p10 }
  0x20   :  { %481 = shalt.err (!%p478_p0)
}
  0x21   :  { %s538_s16 = smov [#allocation3]   ;;  %s482_s17 = scalar_lea.vmem %s46_s14, 32 }
  0x22   :  { %28 = dma.vmem_to_smem %s26_s11, 128, %s538_s16, [#allocation5]  }
  0x23   :  { %p483_p1 = scmp.ne.s32.totalorder %s46_s14, %s482_s17  ;;  %p487_p2 = scmp.lt.s32.totalorder %s46_s14, %s46_s14 }
  0x24   :  { %p488_p3 = scmp.lt.s32.totalorder %s482_s17, %s482_s17 }
  0x26   :  { %p489_p4 = por %p488_p3, %p487_p2 }
  0x28   :  { %p490_p5 = pnand %p489_p4, %p483_p1 }
  0x2a   :  { %493 = shalt.err (!%p490_p5)
}
  0x2b   :  { %s539_s1 = smov [#allocation8]   ;;  %s65_s19 = sshll.u32 %s857_s5, 4  ;;  %s66_s19 = int_to_ptr.vmem [resolvable:$true] %s65_s19 }
  0x2c   :  { %48 = dma.vmem_to_smem %s46_s14, 32, %s539_s1, [#allocation7]  }
  0x2d   :  { %s494_s20 = scalar_lea.vmem %s66_s19, 16  ;;  %p499_p7 = scmp.lt.s32.totalorder %s66_s19, %s66_s19 }
  0x2e   :  { %p495_p6 = scmp.ne.s32.totalorder %s66_s19, %s494_s20  ;;  %p500_p8 = scmp.lt.s32.totalorder %s494_s20, %s494_s20 }
  0x30   :  { %p501_p9 = por %p500_p8, %p499_p7 }
  0x32   :  { %p502_p10 = pnand %p501_p9, %p495_p6 }
  0x34   :  { %505 = shalt.err (!%p502_p10)
}
  0x35   :  { %s540_s21 = smov [#allocation11]  }
  0x36   :  { %68 = dma.vmem_to_smem %s66_s19, 16, %s540_s21, [#allocation10]  }
  0x37   :  { %528 = dma.done.wait [#allocation5], 128  }
  0x38   :  { %529 = vsyncadd [#allocation5], 4294967168 }
  0x39   :  { %530 = dma.done.wait [#allocation7], 48  }
  0x3a   :  { %531 = vsyncadd [#allocation7], 4294967248 }
  0x3b   :  { %532 = dma.done.wait [#allocation10], 32  }
  0x3c   :  { %533 = vsyncadd [#allocation10], 4294967264 }
  0x3d   :  { %86 = sfence }
  0x3e   :  { %s104_s22 = sld [smem:[#allocation3]]  ;;  %s381_s23 = sld [smem:[#allocation3 + $0x1]]  ;;  %v602_v0 = vld [vmem:[%s852_s0] sm:$0x3]  ;;  %v607_v1 = vld [vmem:[%s852_s0 + $0x2] sm:$0x3] }
  0x3f   :  { %s382_s5 = sld [smem:[#allocation3 + $0x2]]  ;;  %s383_s24 = sld [smem:[#allocation3 + $0x3]]  ;;  %v614_v2 = vld [vmem:[%s852_s0 + $0x4] sm:$0x3]  ;;  %v621_v3 = vld [vmem:[%s852_s0 + $0x6] sm:$0x3] }
  0x40   :  { %s384_s25 = sld [smem:[#allocation3 + $0x4]]  ;;  %s597_s26 = sld [smem:[#allocation3 + $0x5]]  ;;  %v632_v10 = vld [vmem:[%s852_s0 + $0x8] sm:$0x3]  ;;  %v642_v13 = vld [vmem:[%s852_s0 + $0xa] sm:$0x3] }
  0x41   :  { %s609_s8 = sld [smem:[#allocation3 + $0x6]]  ;;  %s616_s4 = sld [smem:[#allocation3 + $0x7]]  ;;  %v671_v27 = vld [vmem:[%s852_s0 + $0xc] sm:$0x3]  ;;  %v682_v32 = vld [vmem:[%s852_s0 + $0xe] sm:$0x3] }
  0x42   :  { %s390_s12 = sld [smem:[#allocation3 + $0x80]]  ;;  %s391_s13 = sld [smem:[#allocation3 + $0x81]]  ;;  %v719_v57 = vld [vmem:[%s852_s0 + $0x10] sm:$0x3] }
  0x43   :  { %s625_s14 = sld [smem:[#allocation3 + $0x82]]  ;;  %s627_s15 = sld [smem:[#allocation3 + $0x83]] }
  0x44   :  { %v105_v4 = vstv %s104_s22  ;;  %v108_v5 = vstv %s381_s23  ;;  %s635_s1 = sld [smem:[#allocation3 + $0x84]]  ;;  %s637_s3 = sld [smem:[#allocation3 + $0x85]] }
  0x45   :  { %v106_v6 = vmul.f32 %v105_v4, %v602_v0  ;;  %v109_v7 = vmul.f32 %v607_v1, %v108_v5  ;;  %v112_v8 = vstv %s382_s5  ;;  %v116_v9 = vstv %s383_s24  ;;  %s646_s20 = sld [smem:[#allocation3 + $0x8]]  ;;  %s648_s21 = sld [smem:[#allocation3 + $0x86]] }
  0x46   :  { %v113_v11 = vmul.f32 %v614_v2, %v112_v8  ;;  %v120_v12 = vstv %s384_s25  ;;  %v117_v15 = vmul.f32 %v621_v3, %v116_v9  ;;  %v124_v16 = vstv %s597_s26  ;;  %s651_s22 = sld [smem:[#allocation3 + $0x87]]  ;;  %s653_s23 = sld [smem:[#allocation3 + $0x88]] }
  0x47   :  { %v110_v14 = vadd.f32 %v109_v7, %v106_v6  ;;  %v121_v18 = vmul.f32 %v632_v10, %v120_v12  ;;  %v125_v19 = vmul.f32 %v642_v13, %v124_v16  ;;  %v128_v20 = vstv %s609_s8  ;;  %s657_s5 = sld [smem:[#allocation3 + $0x100]]  ;;  %s659_s24 = sld [smem:[#allocation3 + $0x101]] }
  0x48   :  { %v150_v21 = vstv %s390_s12  ;;  %v153_v22 = vstv %s391_s13  ;;  %s664_s25 = sld [smem:[#allocation3 + $0x102]]  ;;  %s666_s26 = sld [smem:[#allocation3 + $0x103]]  ;;  %v132_v28 = vstv %s616_s4  ;;  %v129_v37 = vmul.f32 %v671_v27, %v128_v20 }
  0x49   :  { %v114_v17 = vadd.f32 %v113_v11, %v110_v14  ;;  %v151_v24 = vmul.f32 %v150_v21, %v602_v0  ;;  %v154_v25 = vmul.f32 %v607_v1, %v153_v22  ;;  %v157_v26 = vstv %s625_s14  ;;  %s677_s29 = sld [smem:[#allocation3 + $0x104]]  ;;  %s686_s9 = sld [smem:[#allocation3 + $0x105]] }
  0x4a   :  { %v158_v29 = vmul.f32 %v614_v2, %v157_v26  ;;  %v161_v30 = vstv %s627_s15  ;;  %v165_v31 = vstv %s635_s1  ;;  %v169_v36 = vstv %s637_s3  ;;  %s688_s2 = sld [smem:[#allocation3 + $0x106]]  ;;  %s696_s4 = sld [smem:[#allocation3 + $0x107]] }
  0x4b   :  { %v118_v23 = vadd.f32 %v117_v15, %v114_v17  ;;  %v155_v34 = vadd.f32 %v154_v25, %v151_v24  ;;  %v162_v35 = vmul.f32 %v621_v3, %v161_v30  ;;  %v136_v38 = vstv %s646_s20  ;;  %s701_s10 = sld [smem:[#allocation3 + $0x180]]  ;;  %s703_s11 = sld [smem:[#allocation3 + $0x181]] }
  0x4c   :  { %v166_v40 = vmul.f32 %v632_v10, %v165_v31  ;;  %v133_v42 = vmul.f32 %v682_v32, %v132_v28  ;;  %v170_v43 = vmul.f32 %v642_v13, %v169_v36  ;;  %v173_v44 = vstv %s648_s21  ;;  %s709_s12 = sld [smem:[#allocation3 + $0x182]]  ;;  %s714_s13 = sld [smem:[#allocation3 + $0x108]] }
  0x4d   :  { %v122_v33 = vadd.f32 %v121_v18, %v118_v23  ;;  %v159_v39 = vadd.f32 %v158_v29, %v155_v34  ;;  %v177_v46 = vstv %s651_s22  ;;  %v197_v47 = vstv %s657_s5  ;;  %s723_s16 = sld [smem:[#allocation3 + $0x183]]  ;;  %s725_s17 = sld [smem:[#allocation3 + $0x184]] }
  0x4e   :  { %v200_v48 = vstv %s659_s24  ;;  %v198_v49 = vmul.f32 %v197_v47, %v602_v0  ;;  %v204_v51 = vstv %s664_s25  ;;  %v208_v52 = vstv %s666_s26  ;;  %s727_s1 = sld [smem:[#allocation6]]  ;;  %s731_s3 = sld [smem:[#allocation3 + $0x185]] }
  0x4f   :  { %v126_v41 = vadd.f32 %v125_v19, %v122_v33  ;;  %v163_v45 = vadd.f32 %v162_v35, %v159_v39  ;;  %v201_v50 = vmul.f32 %v607_v1, %v200_v48  ;;  %v174_v54 = vmul.f32 %v671_v27, %v173_v44  ;;  %s737_s0 = sld [smem:[#allocation6 + $0x1]]  ;;  %s739_s18 = sld [smem:[#allocation3 + $0x186]] }
  0x50   :  { %v181_v55 = vstv %s653_s23  ;;  %v205_v56 = vmul.f32 %v614_v2, %v204_v51  ;;  %v209_v60 = vmul.f32 %v621_v3, %v208_v52  ;;  %v212_v61 = vstv %s677_s29  ;;  %s741_s19 = sld [smem:[#allocation8]]  ;;  %s748_s21 = sld [smem:[#allocation6 + $0x2]] }
  0x51   :  { %v167_v53 = vadd.f32 %v166_v40, %v163_v45  ;;  %v130_v58 = vadd.f32 %v129_v37, %v126_v41  ;;  %v202_v59 = vadd.f32 %v201_v50, %v198_v49  ;;  %v178_v63 = vmul.f32 %v682_v32, %v177_v46  ;;  %s743_s20 = sld [smem:[#allocation8 + $0x80]]  ;;  %s752_s22 = sld [smem:[#allocation3 + $0x187]] }
  0x52   :  { %v216_v4 = vstv %s686_s9  ;;  %v213_v6 = vmul.f32 %v632_v10, %v212_v61  ;;  %v220_v7 = vstv %s688_s2  ;;  %v137_v8 = vmul.f32 %v719_v57, %v136_v38  ;;  %s757_s23 = sld [smem:[#allocation3 + $0x200]]  ;;  %s764_s24 = sld [smem:[#allocation3 + $0x201]] }
  0x53   :  { %v171_v62 = vadd.f32 %v170_v43, %v167_v53  ;;  %v206_v5 = vadd.f32 %v205_v56, %v202_v59  ;;  %v182_v11 = vmul.f32 %v719_v57, %v181_v55  ;;  %v134_v12 = vadd.f32 %v133_v42, %v130_v58  ;;  %s762_s5 = sld [smem:[#allocation3 + $0x188]]  ;;  %s768_s25 = sld [smem:[#allocation3 + $0x202]] }
  0x54   :  { %v217_v15 = vmul.f32 %v642_v13, %v216_v4  ;;  %v224_v16 = vstv %s696_s4  ;;  %v221_v18 = vmul.f32 %v671_v27, %v220_v7  ;;  %v244_v19 = vstv %s701_s10  ;;  %s773_s26 = sld [smem:[#allocation3 + $0x203]]  ;;  %s775_s27 = sld [smem:[#allocation3 + $0x204]] }
  0x55   :  { %v175_v9 = vadd.f32 %v174_v54, %v171_v62  ;;  %v210_v14 = vadd.f32 %v209_v60, %v206_v5  ;;  %v247_v20 = vstv %s703_s11  ;;  %v245_v22 = vmul.f32 %v244_v19, %v602_v0  ;;  %s779_s28 = sld [smem:[#allocation8 + $0x1]]  ;;  %s783_s29 = sld [smem:[#allocation3 + $0x205]] }
  0x56   :  { %v248_v23 = vmul.f32 %v607_v1, %v247_v20  ;;  %v251_v24 = vstv %s709_s12  ;;  %v225_v25 = vmul.f32 %v682_v32, %v224_v16  ;;  %v228_v26 = vstv %s714_s13  ;;  %s786_s30 = sld [smem:[#allocation8 + $0x81]]  ;;  %s792_s8 = sld [smem:[#allocation6 + $0x3]] }
  0x57   :  { %v179_v17 = vadd.f32 %v178_v63, %v175_v9  ;;  %v214_v21 = vadd.f32 %v213_v6, %v210_v14  ;;  %v252_v28 = vmul.f32 %v614_v2, %v251_v24  ;;  %v255_v31 = vstv %s723_s16  ;;  %s794_s9 = sld [smem:[#allocation3 + $0x206]]  ;;  %s801_s2 = sld [smem:[#allocation3 + $0x207]] }
  0x58   :  { %v249_v30 = vadd.f32 %v248_v23, %v245_v22  ;;  %v259_v33 = vstv %s725_s17  ;;  %v138_v34 = vadd.f32 %v137_v8, %v134_v12  ;;  %v140_v35 = vstv %s727_s1  ;;  %s803_s4 = sld [smem:[#allocation8 + $0x2]]  ;;  %s813_s11 = sld [smem:[#allocation3 + $0x208]] }
  0x59   :  { %v218_v29 = vadd.f32 %v217_v15, %v214_v21  ;;  %v256_v36 = vmul.f32 %v621_v3, %v255_v31  ;;  %v263_v37 = vstv %s731_s3  ;;  %v183_v38 = vadd.f32 %v182_v11, %v179_v17  ;;  %s808_s10 = sld [smem:[#allocation8 + $0x82]]  ;;  %s822_s12 = sld [smem:[#allocation8 + $0x3]] }
  0x5a   :  { %v253_v40 = vadd.f32 %v252_v28, %v249_v30  ;;  %v260_v41 = vmul.f32 %v632_v10, %v259_v33  ;;  %v185_v42 = vstv %s737_s0  ;;  %v229_v43 = vmul.f32 %v719_v57, %v228_v26  ;;  %s824_s13 = sld [smem:[#allocation8 + $0x83]]  ;;  %s435_s14 = sld [smem:[#allocation6 + $0x4]] }
  0x5b   :  { %v222_v39 = vadd.f32 %v221_v18, %v218_v29  ;;  %v267_v44 = vstv %s739_s18  ;;  %v144_v45 = vstv %s741_s19  ;;  %v264_v48 = vmul.f32 %v642_v13, %v263_v37  ;;  %s436_s15 = sld [smem:[#allocation8 + $0x4]]  ;;  %s337_s17 = sld [smem:[#allocation9]] }
  0x5c   :  { %v257_v47 = vadd.f32 %v256_v36, %v253_v40  ;;  %v141_v49 = vadd.f32 %v140_v35, %v138_v34  ;;  %v147_v50 = vstv %s743_s20  ;;  %v232_v51 = vstv %s748_s21  ;;  %s437_s16 = sld [smem:[#allocation8 + $0x84]]  ;;  %s438_s1 = sld [smem:[#allocation9 + $0x1]] }
  0x5d   :  { %v226_v46 = vadd.f32 %v225_v25, %v222_v39  ;;  %v271_v52 = vstv %s752_s22  ;;  %v186_v53 = vadd.f32 %v185_v42, %v183_v38  ;;  %v268_v55 = vmul.f32 %v671_v27, %v267_v44  ;;  %s345_s3 = sld [smem:[#allocation11]]  ;;  %s439_s0 = sld [smem:[#allocation11 + $0x1]] }
  0x5e   :  { %v261_v54 = vadd.f32 %v260_v41, %v257_v47  ;;  %v291_v56 = vstv %s757_s23  ;;  %v275_v59 = vstv %s762_s5  ;;  %v294_v61 = vstv %s764_s24  ;;  %s541_s20 = smov [#allocation12]  }
  0x5f   :  { %v230_v58 = vadd.f32 %v229_v43, %v226_v46  ;;  %v292_v60 = vmul.f32 %v291_v56, %v602_v0  ;;  %v272_v63 = vmul.f32 %v682_v32, %v271_v52  ;;  %v295_v4 = vmul.f32 %v607_v1, %v294_v61  ;;  %s362_s21 = sshll.u32 %s541_s20, 4  ;;  %s363_s21 = int_to_ptr.vmem [resolvable:$true] %s362_s21 }
  0x60   :  { %v265_v62 = vadd.f32 %v264_v48, %v261_v54  ;;  %v298_v5 = vstv %s768_s25  ;;  %v142_v6 = vmax.f32 %v141_v49, 0.0  ;;  %v302_v0 = vstv %s773_s26  ;;  %s506_s22 = scalar_lea.vmem %s363_s21, 32  ;;  %p511_p12 = scmp.lt.s32.totalorder %s363_s21, %s363_s21 }
  0x61   :  { %v299_v7 = vmul.f32 %v614_v2, %v298_v5  ;;  %v306_v8 = vstv %s775_s27  ;;  %v276_v11 = vmul.f32 %v719_v57, %v275_v59  ;;  %v296_v12 = vadd.f32 %v295_v4, %v292_v60  ;;  %p507_p11 = scmp.ne.s32.totalorder %s363_s21, %s506_s22  ;;  %p512_p13 = scmp.lt.s32.totalorder %s506_s22, %s506_s22 }
  0x62   :  { %v269_v9 = vadd.f32 %v268_v55, %v265_v62  ;;  %v303_v14 = vmul.f32 %v621_v3, %v302_v0  ;;  %v187_v1 = vmax.f32 %v186_v53, 0.0  ;;  %v189_v15 = vstv %s779_s28 }
  0x63   :  { %v233_v16 = vadd.f32 %v232_v51, %v230_v58  ;;  %v310_v17 = vstv %s783_s29  ;;  %v193_v18 = vstv %s786_s30  ;;  %v300_v2 = vadd.f32 %v299_v7, %v296_v12  ;;  %p513_p0 = por %p512_p13, %p511_p12 }
  0x64   :  { %v273_v19 = vadd.f32 %v272_v63, %v269_v9  ;;  %v307_v20 = vmul.f32 %v632_v10, %v306_v8  ;;  %v145_v21 = vmul.f32 %v144_v45, %v142_v6  ;;  %v279_v22 = vstv %s792_s8 }
  0x65   :  { %v314_v3 = vstv %s794_s9  ;;  %v148_v23 = vmul.f32 %v147_v50, %v142_v6  ;;  %v304_v25 = vadd.f32 %v303_v14, %v300_v2  ;;  %v311_v26 = vmul.f32 %v642_v13, %v310_v17  ;;  %p514_p1 = pnand %p513_p0, %p507_p11 }
  0x66   :  { %v277_v24 = vadd.f32 %v276_v11, %v273_v19  ;;  %v190_v28 = vmul.f32 %v189_v15, %v187_v1  ;;  %v194_v29 = vmul.f32 %v193_v18, %v187_v1  ;;  %v234_v30 = vmax.f32 %v233_v16, 0.0 }
  0x67   :  { %v318_v31 = vstv %s801_s2  ;;  %v236_v10 = vstv %s803_s4  ;;  %v308_v34 = vadd.f32 %v307_v20, %v304_v25  ;;  %v315_v35 = vmul.f32 %v671_v27, %v314_v3 }
  0x68   :  { %v280_v33 = vadd.f32 %v279_v22, %v277_v24  ;;  %v240_v36 = vstv %s808_s10  ;;  %v322_v37 = vstv %s813_s11  ;;  %v319_v39 = vmul.f32 %v682_v32, %v318_v31 }
  0x69   :  { %v312_v38 = vadd.f32 %v311_v26, %v308_v34  ;;  %v191_v40 = vadd.f32 %v190_v28, %v145_v21  ;;  %v195_v41 = vadd.f32 %v194_v29, %v148_v23  ;;  %v237_v13 = vmul.f32 %v236_v10, %v234_v30 }
  0x6a   :  { %v241_v42 = vmul.f32 %v240_v36, %v234_v30  ;;  %v281_v43 = vmax.f32 %v280_v33, 0.0  ;;  %v323_v45 = vmul.f32 %v719_v57, %v322_v37  ;;  %v283_v46 = vstv %s822_s12 }
  0x6b   :  { %v316_v44 = vadd.f32 %v315_v35, %v312_v38  ;;  %v287_v47 = vstv %s824_s13  ;;  %v238_v49 = vadd.f32 %v237_v13, %v191_v40  ;;  %v326_v27 = vstv %s435_s14 }
  0x6c   :  { %v242_v50 = vadd.f32 %v241_v42, %v195_v41  ;;  %v284_v51 = vmul.f32 %v283_v46, %v281_v43  ;;  %v288_v32 = vmul.f32 %v287_v47, %v281_v43  ;;  %v330_v54 = vstv %s436_s15 }
  0x6d   :  { %v320_v48 = vadd.f32 %v319_v39, %v316_v44  ;;  %v334_v55 = vstv %s437_s16  ;;  %v338_v61 = vstv %s337_s17  ;;  %v342_v62 = vstv %s438_s1 }
  0x6e   :  { %v285_v56 = vadd.f32 %v284_v51, %v238_v49  ;;  %v289_v58 = vadd.f32 %v288_v32, %v242_v50  ;;  %v346_v7 = vstv %s345_s3  ;;  %v349_v0 = vstv %s439_s0 }
  0x6f   :  { %v324_v52 = vadd.f32 %v323_v45, %v320_v48  ;;  %v353_v14 = vstv %s858_s6 }
  0x71   :  { %v327_v53 = vadd.f32 %v326_v27, %v324_v52 }
  0x73   :  { %v328_v59 = vmax.f32 %v327_v53, 0.0 }
  0x75   :  { %v331_v57 = vmul.f32 %v330_v54, %v328_v59  ;;  %v335_v60 = vmul.f32 %v334_v55, %v328_v59 }
  0x77   :  { %v332_v63 = vadd.f32 %v331_v57, %v285_v56  ;;  %v336_v4 = vadd.f32 %v335_v60, %v289_v58 }
  0x79   :  { %v339_v5 = vadd.f32 %v338_v61, %v332_v63  ;;  %v343_v6 = vadd.f32 %v342_v62, %v336_v4 }
  0x7b   :  { %v340_v8 = vmax.f32 %v339_v5, 0.0  ;;  %v344_v9 = vmax.f32 %v343_v6, 0.0 }
  0x7d   :  { %v347_v11 = vmul.f32 %v346_v7, %v340_v8  ;;  %v350_v12 = vmul.f32 %v349_v0, %v344_v9 }
  0x7f   :  { %v351_v1 = vadd.f32 %v350_v12, %v347_v11 }
  0x81   :  { %v354_v15 = vadd.f32 %v353_v14, %v351_v1 }
  0x83   :  { %355 = vst [vmem:[#allocation12] sm:$0x3] %v354_v15 }
  0x84   :  { %517 = shalt.err (!%p514_p1)
}
  0x85   :  { %s518_s24 = scalar_lea.hbm %s859_s7, 32 }
  0x86   :  { %p519_p2 = scmp.ne.s32.totalorder %s859_s7, %s518_s24  ;;  %p522_p3 = scmp.lt.u32.totalorder %s518_s24, %s859_s7 }
  0x88   :  { %p524_p4 = pnand %p522_p3, %p519_p2 }
  0x8a   :  { %527 = shalt.err (!%p524_p4)
}
  0x8b   :  { %365 = dma.vmem_to_hbm [thread:$0]  %s363_s21, 32, %s859_s7, [#allocation4]  }
  0x8c   :  { %534 = dma.done.wait [#allocation4], 32  }
  0x8d   :  { %535 = vsyncadd [#allocation4], 4294967264 }
  0x8e   :  { %369 = vsyncpa [#allocation4], 1 }
  0x8f   :  { %370 = vsyncpa [#allocation5], 1 }
  0x90   :  { %371 = vsyncpa [#allocation7], 1 }
  0x91   :  { %372 = vsyncpa [#allocation10], 1 }

</bundles_post_ra>
